<compile_context>
chip_gen: v5e
topology: v5e:2x2
jax: 0.10.0
libtpu: 0.0.40
codegen_flags: <defaults>
</compile_context>

<pallas_src>
import jax
import jax.numpy as jnp
from jax.experimental import pallas as pl
from jax.experimental.pallas import tpu as pltpu

_LANE = 128


def inpainting_forward(shadows, masks, w_down, w_up, bias, *, max_tile_rows=256):
    """shadows: (B, C, H, W) f32, masks: (B, 1, H, W) f32 -> (B, C_out, H, W) f32."""
    B, C, H, W = shadows.shape
    C_out = w_down.shape[0]
    HW = H * W

    # ---- spatial layout: HW -> (rows, 128) slabs, padded so tiles divide evenly
    rows = (HW + _LANE - 1) // _LANE
    if rows <= max_tile_rows:
        tr = rows                       # full extent (satisfies tiling rule even if < 8)
        rows_pad = rows
    else:
        tr = max_tile_rows              # multiple of 8 by construction (see assert)
        rows_pad = ((rows + tr - 1) // tr) * tr
    assert tr == rows_pad or tr % 8 == 0
    HW_pad = rows_pad * _LANE

    # bf16 for HBM traffic of the big operands; f32 compute in-kernel.
    sh = shadows.reshape(B, C, HW).astype(jnp.bfloat16)
    mk = masks.reshape(B, 1, HW).astype(jnp.bfloat16)
    if HW_pad != HW:
        sh = jnp.pad(sh, ((0, 0), (0, 0), (0, HW_pad - HW)))
        mk = jnp.pad(mk, ((0, 0), (0, 0), (0, HW_pad - HW)))
    sh = sh.reshape(B, C, rows_pad, _LANE)
    mk = mk.reshape(B, 1, rows_pad, _LANE)

    # ---- tiny weights: precombine in the wrapper, ship as SMEM scalars
    wd_flat = w_down[:, :C].reshape(-1).astype(jnp.float32)        # (C_out*C,)
    wu_flat = w_up[:, :C].reshape(-1).astype(jnp.float32)          # (C_out*C,)
    # wm[o] = wd[o, C] + wu[o, C]  (both mask columns collapse onto one term)
    wmb = jnp.concatenate(
        [w_down[:, C] + w_up[:, C], bias.reshape(C_out)]
    ).astype(jnp.float32)                                          # (2*C_out,)

    def kernel(wd_ref, wu_ref, wmb_ref, s_ref, m_ref, o_ref):
        # s_ref: (1, C, tr, 128) bf16 ; m_ref: (1, 1, tr, 128) bf16
        # o_ref: (1, C_out, tr, 128) f32
        m = m_ref[0, 0].astype(jnp.float32)          # (tr, 128)
        keep = 1.0 - m
        s = [s_ref[0, c].astype(jnp.float32) for c in range(C)]  # C full vreg slabs
        for o in range(C_out):
            pd = wd_ref[o * C] * s[0]                # P_d[o] = wd[o,:C] @ s
            pu = wu_ref[o * C] * s[0]                # P_u[o] = wu[o,:C] @ s
            for c in range(1, C):
                pd = pd + wd_ref[o * C + c] * s[c]
                pu = pu + wu_ref[o * C + c] * s[c]
            # out = P_d + P_u*(1-m) + (wd[:,C]+wu[:,C])*m + bias
            val = pd + pu * keep + wmb_ref[o] * m + wmb_ref[C_out + o]
            o_ref[0, o] = jnp.tanh(val).astype(o_ref.dtype)

    grid = (B, rows_pad // tr)
    out = pl.pallas_call(
        kernel,
        out_shape=jax.ShapeDtypeStruct((B, C_out, rows_pad, _LANE), jnp.float32),
        grid_spec=pltpu.PrefetchScalarGridSpec(
            num_scalar_prefetch=0,
            grid=grid,
            in_specs=[
                pl.BlockSpec(memory_space=pltpu.MemorySpace.SMEM),   # wd_flat
                pl.BlockSpec(memory_space=pltpu.MemorySpace.SMEM),   # wu_flat
                pl.BlockSpec(memory_space=pltpu.MemorySpace.SMEM),   # wm + bias
                pl.BlockSpec((1, C, tr, _LANE), lambda b, t: (b, 0, t, 0)),
                pl.BlockSpec((1, 1, tr, _LANE), lambda b, t: (b, 0, t, 0)),
            ],
            out_specs=pl.BlockSpec((1, C_out, tr, _LANE), lambda b, t: (b, 0, t, 0)),
        ),
        compiler_params=pltpu.CompilerParams(
            dimension_semantics=("parallel", "parallel"),
        ),
    )(wd_flat, wu_flat, wmb, sh, mk)

    out = out.reshape(B, C_out, HW_pad)[:, :, :HW]
    return out.reshape(B, C_out, H, W)


def _reference_forward(shadows, masks, w_down, w_up, bias):
    """Pure-JAX reference (mirrors the PyTorch forward + 1x1-conv stand-in)."""
    shadows_masked = shadows * (1.0 - masks)
    inputs_up = jnp.concatenate((shadows_masked, masks), axis=1)    # (B, C+1, H, W)
    inputs_down = jnp.concatenate((shadows, masks), axis=1)         # (B, C+1, H, W)
    out = (
        jnp.einsum("oc,bchw->bohw", w_down, inputs_down)
        + jnp.einsum("oc,bchw->bohw", w_up, inputs_up)
        + bias[None, :, None, None]
    )
    return jnp.tanh(out)


def _check_case(key, B, C, H, W, C_out, max_tile_rows):
    k_sh, k_mk, k_wd, k_wu, k_b = jax.random.split(key, 5)
    shadows = jax.random.uniform(k_sh, (B, C, H, W), dtype=jnp.float32)
    masks = jnp.round(jax.random.uniform(k_mk, (B, 1, H, W), dtype=jnp.float32))
    w_down = 0.1 * jax.random.normal(k_wd, (C_out, C + 1), dtype=jnp.float32)
    w_up = 0.1 * jax.random.normal(k_wu, (C_out, C + 1), dtype=jnp.float32)
    bias = 0.01 * jax.random.normal(k_b, (C_out,), dtype=jnp.float32)

    out = inpainting_forward(shadows, masks, w_down, w_up, bias,
                             max_tile_rows=max_tile_rows)
    out = jax.block_until_ready(out)

    # Reference computed from the same bf16-rounded inputs the kernel consumes.
    sh_bf = shadows.astype(jnp.bfloat16).astype(jnp.float32)
    mk_bf = masks.astype(jnp.bfloat16).astype(jnp.float32)
    ref = _reference_forward(sh_bf, mk_bf, w_down, w_up, bias)

    assert out.shape == (B, C_out, H, W)
    assert jnp.allclose(out, ref, atol=1e-4, rtol=1e-4), \
        f"mismatch vs pure-JAX reference for shape {(B, C, H, W)}"


if __name__ == "__main__":
    key = jax.random.PRNGKey(0)
    k0, k1, k2 = jax.random.split(key, 3)

    # Main small case (RGB shadows + single-channel mask, as the module implies).
    _check_case(k0, B=2, C=3, H=16, W=16, C_out=3, max_tile_rows=256)
    # Exercises the HW-tiling path (rows=128 split into 32-row tiles, grid=(1, 4)).
    _check_case(k1, B=1, C=3, H=128, W=128, C_out=3, max_tile_rows=32)
    # Exercises lane padding (H*W = 400, not a multiple of 128).
    _check_case(k2, B=2, C=3, H=20, W=20, C_out=3, max_tile_rows=256)

    print("KERNEL_OK")
</pallas_src>

<mosaic_0001>
module attributes {stable_mosaic.version = 11 : i64} {
  func.func @kernel(%arg0: i32, %arg1: i32, %arg2: memref<9xf32, #tpu.memory_space<smem>>, %arg3: memref<9xf32, #tpu.memory_space<smem>>, %arg4: memref<6xf32, #tpu.memory_space<smem>>, %arg5: memref<1x3x2x128xbf16, #tpu.memory_space<vmem>>, %arg6: memref<1x1x2x128xbf16, #tpu.memory_space<vmem>>, %arg7: memref<1x3x2x128xf32, #tpu.memory_space<vmem>>) attributes {dimension_semantics = [#tpu.dimension_semantics<parallel>, #tpu.dimension_semantics<parallel>], iteration_bounds = array<i64: 2, 1>, scalar_prefetch = 0 : i64, scratch_operands = 0 : i64, tpu.core_type = #tpu.core_type<tc>, window_params = [{transform_indices = @transform_0, window_bounds = array<i64: 9>}, {transform_indices = @transform_1, window_bounds = array<i64: 9>}, {transform_indices = @transform_2, window_bounds = array<i64: 6>}, {transform_indices = @transform_3, window_bounds = array<i64: 1, 3, 2, 128>}, {transform_indices = @transform_4, window_bounds = array<i64: 1, 1, 2, 128>}, {transform_indices = @transform_5, window_bounds = array<i64: 1, 3, 2, 128>}]} {
    %c0 = arith.constant 0 : index
    %c0_0 = arith.constant 0 : index
    %c0_1 = arith.constant 0 : index
    %c0_2 = arith.constant 0 : index
    %0 = vector.load %arg6[%c0, %c0_0, %c0_1, %c0_2] : memref<1x1x2x128xbf16, #tpu.memory_space<vmem>>, vector<1x1x2x128xbf16>
    %1 = vector.shape_cast %0 : vector<1x1x2x128xbf16> to vector<2x128xbf16>
    %2 = arith.extf %1 : vector<2x128xbf16> to vector<2x128xf32>
    %cst = arith.constant 1.000000e+00 : f32
    %3 = vector.broadcast %cst : f32 to vector<2x128xf32>
    %4 = arith.subf %3, %2 : vector<2x128xf32>
    %c0_3 = arith.constant 0 : index
    %c0_4 = arith.constant 0 : index
    %c0_5 = arith.constant 0 : index
    %c0_6 = arith.constant 0 : index
    %5 = vector.load %arg5[%c0_3, %c0_4, %c0_5, %c0_6] : memref<1x3x2x128xbf16, #tpu.memory_space<vmem>>, vector<1x1x2x128xbf16>
    %6 = vector.shape_cast %5 : vector<1x1x2x128xbf16> to vector<2x128xbf16>
    %7 = arith.extf %6 : vector<2x128xbf16> to vector<2x128xf32>
    %c0_7 = arith.constant 0 : index
    %c1 = arith.constant 1 : index
    %c0_8 = arith.constant 0 : index
    %c0_9 = arith.constant 0 : index
    %8 = vector.load %arg5[%c0_7, %c1, %c0_8, %c0_9] : memref<1x3x2x128xbf16, #tpu.memory_space<vmem>>, vector<1x1x2x128xbf16>
    %9 = vector.shape_cast %8 : vector<1x1x2x128xbf16> to vector<2x128xbf16>
    %10 = arith.extf %9 : vector<2x128xbf16> to vector<2x128xf32>
    %c0_10 = arith.constant 0 : index
    %c2 = arith.constant 2 : index
    %c0_11 = arith.constant 0 : index
    %c0_12 = arith.constant 0 : index
    %11 = vector.load %arg5[%c0_10, %c2, %c0_11, %c0_12] : memref<1x3x2x128xbf16, #tpu.memory_space<vmem>>, vector<1x1x2x128xbf16>
    %12 = vector.shape_cast %11 : vector<1x1x2x128xbf16> to vector<2x128xbf16>
    %13 = arith.extf %12 : vector<2x128xbf16> to vector<2x128xf32>
    %c0_13 = arith.constant 0 : index
    %14 = memref.load %arg2[%c0_13] : memref<9xf32, #tpu.memory_space<smem>>
    %15 = vector.broadcast %14 : f32 to vector<2x128xf32>
    %16 = arith.mulf %15, %7 : vector<2x128xf32>
    %c0_14 = arith.constant 0 : index
    %17 = memref.load %arg3[%c0_14] : memref<9xf32, #tpu.memory_space<smem>>
    %18 = vector.broadcast %17 : f32 to vector<2x128xf32>
    %19 = arith.mulf %18, %7 : vector<2x128xf32>
    %c1_15 = arith.constant 1 : index
    %20 = memref.load %arg2[%c1_15] : memref<9xf32, #tpu.memory_space<smem>>
    %21 = vector.broadcast %20 : f32 to vector<2x128xf32>
    %22 = arith.mulf %21, %10 : vector<2x128xf32>
    %23 = arith.addf %16, %22 : vector<2x128xf32>
    %c1_16 = arith.constant 1 : index
    %24 = memref.load %arg3[%c1_16] : memref<9xf32, #tpu.memory_space<smem>>
    %25 = vector.broadcast %24 : f32 to vector<2x128xf32>
    %26 = arith.mulf %25, %10 : vector<2x128xf32>
    %27 = arith.addf %19, %26 : vector<2x128xf32>
    %c2_17 = arith.constant 2 : index
    %28 = memref.load %arg2[%c2_17] : memref<9xf32, #tpu.memory_space<smem>>
    %29 = vector.broadcast %28 : f32 to vector<2x128xf32>
    %30 = arith.mulf %29, %13 : vector<2x128xf32>
    %31 = arith.addf %23, %30 : vector<2x128xf32>
    %c2_18 = arith.constant 2 : index
    %32 = memref.load %arg3[%c2_18] : memref<9xf32, #tpu.memory_space<smem>>
    %33 = vector.broadcast %32 : f32 to vector<2x128xf32>
    %34 = arith.mulf %33, %13 : vector<2x128xf32>
    %35 = arith.addf %27, %34 : vector<2x128xf32>
    %36 = arith.mulf %35, %4 : vector<2x128xf32>
    %37 = arith.addf %31, %36 : vector<2x128xf32>
    %c0_19 = arith.constant 0 : index
    %38 = memref.load %arg4[%c0_19] : memref<6xf32, #tpu.memory_space<smem>>
    %39 = vector.broadcast %38 : f32 to vector<2x128xf32>
    %40 = arith.mulf %39, %2 : vector<2x128xf32>
    %41 = arith.addf %37, %40 : vector<2x128xf32>
    %c3 = arith.constant 3 : index
    %42 = memref.load %arg4[%c3] : memref<6xf32, #tpu.memory_space<smem>>
    %43 = vector.broadcast %42 : f32 to vector<2x128xf32>
    %44 = arith.addf %41, %43 : vector<2x128xf32>
    %45 = math.tanh %44 : vector<2x128xf32>
    %c0_20 = arith.constant 0 : index
    %c0_21 = arith.constant 0 : index
    %c0_22 = arith.constant 0 : index
    %c0_23 = arith.constant 0 : index
    %46 = vector.load %arg7[%c0_20, %c0_21, %c0_22, %c0_23] : memref<1x3x2x128xf32, #tpu.memory_space<vmem>>, vector<1x1x2x128xf32>
    %47 = vector.shape_cast %46 : vector<1x1x2x128xf32> to vector<2x128xf32>
    %48 = vector.shape_cast %45 : vector<2x128xf32> to vector<1x1x2x128xf32>
    tpu.vector_store %arg7[%c0_20, %c0_21, %c0_22, %c0_23], %48 {strides = array<i32>} : memref<1x3x2x128xf32, #tpu.memory_space<vmem>>, vector<1x1x2x128xf32>,
    %c3_24 = arith.constant 3 : index
    %49 = memref.load %arg2[%c3_24] : memref<9xf32, #tpu.memory_space<smem>>
    %50 = vector.broadcast %49 : f32 to vector<2x128xf32>
    %51 = arith.mulf %50, %7 : vector<2x128xf32>
    %c3_25 = arith.constant 3 : index
    %52 = memref.load %arg3[%c3_25] : memref<9xf32, #tpu.memory_space<smem>>
    %53 = vector.broadcast %52 : f32 to vector<2x128xf32>
    %54 = arith.mulf %53, %7 : vector<2x128xf32>
    %c4 = arith.constant 4 : index
    %55 = memref.load %arg2[%c4] : memref<9xf32, #tpu.memory_space<smem>>
    %56 = vector.broadcast %55 : f32 to vector<2x128xf32>
    %57 = arith.mulf %56, %10 : vector<2x128xf32>
    %58 = arith.addf %51, %57 : vector<2x128xf32>
    %c4_26 = arith.constant 4 : index
    %59 = memref.load %arg3[%c4_26] : memref<9xf32, #tpu.memory_space<smem>>
    %60 = vector.broadcast %59 : f32 to vector<2x128xf32>
    %61 = arith.mulf %60, %10 : vector<2x128xf32>
    %62 = arith.addf %54, %61 : vector<2x128xf32>
    %c5 = arith.constant 5 : index
    %63 = memref.load %arg2[%c5] : memref<9xf32, #tpu.memory_space<smem>>
    %64 = vector.broadcast %63 : f32 to vector<2x128xf32>
    %65 = arith.mulf %64, %13 : vector<2x128xf32>
    %66 = arith.addf %58, %65 : vector<2x128xf32>
    %c5_27 = arith.constant 5 : index
    %67 = memref.load %arg3[%c5_27] : memref<9xf32, #tpu.memory_space<smem>>
    %68 = vector.broadcast %67 : f32 to vector<2x128xf32>
    %69 = arith.mulf %68, %13 : vector<2x128xf32>
    %70 = arith.addf %62, %69 : vector<2x128xf32>
    %71 = arith.mulf %70, %4 : vector<2x128xf32>
    %72 = arith.addf %66, %71 : vector<2x128xf32>
    %c1_28 = arith.constant 1 : index
    %73 = memref.load %arg4[%c1_28] : memref<6xf32, #tpu.memory_space<smem>>
    %74 = vector.broadcast %73 : f32 to vector<2x128xf32>
    %75 = arith.mulf %74, %2 : vector<2x128xf32>
    %76 = arith.addf %72, %75 : vector<2x128xf32>
    %c4_29 = arith.constant 4 : index
    %77 = memref.load %arg4[%c4_29] : memref<6xf32, #tpu.memory_space<smem>>
    %78 = vector.broadcast %77 : f32 to vector<2x128xf32>
    %79 = arith.addf %76, %78 : vector<2x128xf32>
    %80 = math.tanh %79 : vector<2x128xf32>
    %c0_30 = arith.constant 0 : index
    %c1_31 = arith.constant 1 : index
    %c0_32 = arith.constant 0 : index
    %c0_33 = arith.constant 0 : index
    %81 = vector.load %arg7[%c0_30, %c1_31, %c0_32, %c0_33] : memref<1x3x2x128xf32, #tpu.memory_space<vmem>>, vector<1x1x2x128xf32>
    %82 = vector.shape_cast %81 : vector<1x1x2x128xf32> to vector<2x128xf32>
    %83 = vector.shape_cast %80 : vector<2x128xf32> to vector<1x1x2x128xf32>
    tpu.vector_store %arg7[%c0_30, %c1_31, %c0_32, %c0_33], %83 {strides = array<i32>} : memref<1x3x2x128xf32, #tpu.memory_space<vmem>>, vector<1x1x2x128xf32>,
    %c6 = arith.constant 6 : index
    %84 = memref.load %arg2[%c6] : memref<9xf32, #tpu.memory_space<smem>>
    %85 = vector.broadcast %84 : f32 to vector<2x128xf32>
    %86 = arith.mulf %85, %7 : vector<2x128xf32>
    %c6_34 = arith.constant 6 : index
    %87 = memref.load %arg3[%c6_34] : memref<9xf32, #tpu.memory_space<smem>>
    %88 = vector.broadcast %87 : f32 to vector<2x128xf32>
    %89 = arith.mulf %88, %7 : vector<2x128xf32>
    %c7 = arith.constant 7 : index
    %90 = memref.load %arg2[%c7] : memref<9xf32, #tpu.memory_space<smem>>
    %91 = vector.broadcast %90 : f32 to vector<2x128xf32>
    %92 = arith.mulf %91, %10 : vector<2x128xf32>
    %93 = arith.addf %86, %92 : vector<2x128xf32>
    %c7_35 = arith.constant 7 : index
    %94 = memref.load %arg3[%c7_35] : memref<9xf32, #tpu.memory_space<smem>>
    %95 = vector.broadcast %94 : f32 to vector<2x128xf32>
    %96 = arith.mulf %95, %10 : vector<2x128xf32>
    %97 = arith.addf %89, %96 : vector<2x128xf32>
    %c8 = arith.constant 8 : index
    %98 = memref.load %arg2[%c8] : memref<9xf32, #tpu.memory_space<smem>>
    %99 = vector.broadcast %98 : f32 to vector<2x128xf32>
    %100 = arith.mulf %99, %13 : vector<2x128xf32>
    %101 = arith.addf %93, %100 : vector<2x128xf32>
    %c8_36 = arith.constant 8 : index
    %102 = memref.load %arg3[%c8_36] : memref<9xf32, #tpu.memory_space<smem>>
    %103 = vector.broadcast %102 : f32 to vector<2x128xf32>
    %104 = arith.mulf %103, %13 : vector<2x128xf32>
    %105 = arith.addf %97, %104 : vector<2x128xf32>
    %106 = arith.mulf %105, %4 : vector<2x128xf32>
    %107 = arith.addf %101, %106 : vector<2x128xf32>
    %c2_37 = arith.constant 2 : index
    %108 = memref.load %arg4[%c2_37] : memref<6xf32, #tpu.memory_space<smem>>
    %109 = vector.broadcast %108 : f32 to vector<2x128xf32>
    %110 = arith.mulf %109, %2 : vector<2x128xf32>
    %111 = arith.addf %107, %110 : vector<2x128xf32>
    %c5_38 = arith.constant 5 : index
    %112 = memref.load %arg4[%c5_38] : memref<6xf32, #tpu.memory_space<smem>>
    %113 = vector.broadcast %112 : f32 to vector<2x128xf32>
    %114 = arith.addf %111, %113 : vector<2x128xf32>
    %115 = math.tanh %114 : vector<2x128xf32>
    %c0_39 = arith.constant 0 : index
    %c2_40 = arith.constant 2 : index
    %c0_41 = arith.constant 0 : index
    %c0_42 = arith.constant 0 : index
    %116 = vector.load %arg7[%c0_39, %c2_40, %c0_41, %c0_42] : memref<1x3x2x128xf32, #tpu.memory_space<vmem>>, vector<1x1x2x128xf32>
    %117 = vector.shape_cast %116 : vector<1x1x2x128xf32> to vector<2x128xf32>
    %118 = vector.shape_cast %115 : vector<2x128xf32> to vector<1x1x2x128xf32>
    tpu.vector_store %arg7[%c0_39, %c2_40, %c0_41, %c0_42], %118 {strides = array<i32>} : memref<1x3x2x128xf32, #tpu.memory_space<vmem>>, vector<1x1x2x128xf32>,
    return
  }
  func.func @transform_0(%arg0: i32, %arg1: i32) -> i32 {
    %c0_i32 = arith.constant 0 : i32
    %c0_i32_0 = arith.constant 0 : i32
    return %c0_i32 : i32
  }
  func.func @transform_1(%arg0: i32, %arg1: i32) -> i32 {
    %c0_i32 = arith.constant 0 : i32
    %c0_i32_0 = arith.constant 0 : i32
    return %c0_i32 : i32
  }
  func.func @transform_2(%arg0: i32, %arg1: i32) -> i32 {
    %c0_i32 = arith.constant 0 : i32
    %c0_i32_0 = arith.constant 0 : i32
    return %c0_i32 : i32
  }
  func.func @transform_3(%arg0: i32, %arg1: i32) -> (i32, i32, i32, i32) {
    %c0_i32 = arith.constant 0 : i32
    %c0_i32_0 = arith.constant 0 : i32
    %c0_i32_1 = arith.constant 0 : i32
    return %arg0, %c0_i32, %arg1, %c0_i32_0 : i32, i32, i32, i32
  }
  func.func @transform_4(%arg0: i32, %arg1: i32) -> (i32, i32, i32, i32) {
    %c0_i32 = arith.constant 0 : i32
    %c0_i32_0 = arith.constant 0 : i32
    %c0_i32_1 = arith.constant 0 : i32
    return %arg0, %c0_i32, %arg1, %c0_i32_0 : i32, i32, i32, i32
  }
  func.func @transform_5(%arg0: i32, %arg1: i32) -> (i32, i32, i32, i32) {
    %c0_i32 = arith.constant 0 : i32
    %c0_i32_0 = arith.constant 0 : i32
    %c0_i32_1 = arith.constant 0 : i32
    return %arg0, %c0_i32, %arg1, %c0_i32_0 : i32, i32, i32, i32
  }
}

</mosaic_0001>

<bundles_post_ra>
// kernel: tpu_custom_call.1
= control target key start
LH: loop header
LB: loop body
LE: loop exit
PB: predicated region body
PF: predicated region fallthrough
CT: control target
= control target key end

     0   :  { %s1153_s0 = inlined_call_operand.hbm [shape: f32[9], index: 0, kind: input, shape index: {}]   ;;  %s1154_s1 = inlined_call_operand.hbm [shape: f32[9], index: 1, kind: input, shape index: {}]   ;;  %s1155_s2 = inlined_call_operand.vmem [shape: f32[6], index: 2, kind: input, shape index: {}]   ;;  %s1156_s3 = inlined_call_operand.hbm [shape: bf16[2,3,2,128], index: 3, kind: input, shape index: {}]   ;;  %s1157_s4 = inlined_call_operand.vmem [shape: bf16[2,1,2,128], index: 4, kind: input, shape index: {}]   ;;  %s1158_s5 = inlined_call_operand.hbm [shape: f32[2,3,2,128], index: 5, kind: output, shape index: {}]  }
   0x1   :  { %1159 = sst [smem:[#allocation17_spill]] %s1153_s0 }
   0x2   :  { %1160 = sst [smem:[#allocation18_spill]] %s1154_s1 }
   0x3   :  { %10 = vsyncpa [#allocation5], 0 }
   0x4   :  { %11 = vsyncpa [#allocation8], 0 }
   0x5   :  { %12 = vsyncpa [#allocation6], 0 }
   0x6   :  { %13 = vsyncpa [#allocation3], 0 }
   0x7   :  { %15 = vsyncpa [#allocation3 + $0x1], 0 }
   0x8   :  { %16 = vsyncpa [#allocation4], 0 }
   0x9   :  { %18 = vsyncpa [#allocation4 + $0x1], 0  ;;  %s940_s18 = smov 0   ;;  %s942_s19 = smov 0  }
   0xa   :  { %s944_s20 = smov 0   ;;  %s946_s21 = smov 0  }
   0xb   :  { %s948_s22 = smov 0   ;;  %s950_s23 = smov 0  }
   0xc LB: > { %s585_s24 = sadd.s32 4294967295, %s901_s23   ;;  %s586_s25 = sadd.s32 4294967294, %s901_s23   ;;  %s901_s23 = sphi %s950_s23, %s24_s23   ;;  %s897_s22 = sphi %s948_s22, %s1173_s22   ;;  %s893_s21 = sphi %s946_s21, %s1172_s21   ;;  %s889_s20 = sphi %s944_s20, %s1171_s20   ;;  %s885_s19 = sphi %s942_s19, %s1170_s19   ;;  %s881_s18 = sphi %s940_s18, %s1169_s18  }
   0xd   : > { %p121_p0 = scmp.ne.s32.totalorder %s885_s19, %s881_s18  ;;  %p974_p1 = scmp.eq.s32.totalorder %s585_s24, 0 }
   0xe   : > { %p978_p2 = scmp.eq.s32.totalorder %s585_s24, 1  ;;  %p181_p3 = scmp.eq.s32.totalorder %s586_s25, 1 }
   0xf   : > { %p984_p4 = por %p974_p1, %p121_p0  ;;  %p587_p5 = scmp.ge.s32.totalorder %s901_s23, 1 }
  0x10   : > { %p989_p6 = por %p181_p3, %p121_p0  ;;  %p188_p7 = scmp.lt.s32.totalorder %s901_s23, 3 }
  0x11   : > { %s1165_s0 = sld [smem:[#allocation17_spill]]  ;;  %p591_p9 = scmp.ge.s32.totalorder %s901_s23, 2 }
  0x12   : > { %p997_p8 = pnand %p587_p5, %p188_p7  ;;  %s1167_s1 = sld [smem:[#allocation18_spill]] }
  0x13   : > { %s220_s14 = sshll.u32 %s1155_s2, 4  ;;  %s903_s15 = smov [#allocation2]   ;;  %s221_s14 = int_to_ptr.vmem [resolvable:$true] %s220_s14 }
  0x14   : > { %p645_p10 = pneg %p997_p8  ;;  %s904_s16 = smov [#allocation7]  }
  0x15   : > { %s905_s17 = smov [#allocation9]   ;;  %s108_s24 = sadd.s32 1, %s889_s20 }
  0x16   : > { %p646_p11 = pnand %p645_p10, %p974_p1  ;;  %s36_s25 = sadd.s32 1, %s897_s22 }
  0x17   : > { %s200_s7 = sshll.u32 %s1165_s0, 4  ;;  %p115_p12 = scmp.ne.s32.totalorder %s889_s20, %s885_s19  ;;  %s201_s7 = int_to_ptr.hbm [resolvable:$true] %s200_s7 }
  0x18   : > { %s210_s11 = sshll.u32 %s1167_s1, 4  ;;  %p38_p13 = scmp.ge.s32.totalorder %s36_s25, 2  ;;  %s211_s11 = int_to_ptr.hbm [resolvable:$true] %s210_s11 }
  0x19   : > { %648 = dma.hbm_to_smem (!%p646_p11), %s201_s7, 16, %s903_s15, [#allocation5]  }
  0x1a   : > { %651 = dma.hbm_to_smem (!%p646_p11), %s211_s11, 16, %s904_s16, [#allocation8]  }
  0x1b   : > { %654 = dma.vmem_to_smem (!%p646_p11), %s221_s14, 16, %s905_s17, [#allocation6]  }
  0x1c   : > { %p116_p0 = scmp.eq.s32.totalorder %s901_s23, 0  ;;  %p1019_p3 = por %p978_p2, %p115_p12 }
  0x1d   : > { %p666_p5 = scmp.lt.s32.totalorder %s901_s23, 2  ;;  %s1175_s25 = smov (%p38_p13, %s36_s25), 0 }
  0x1e   : > { %p117_p7 = por %p116_p0, %p115_p12  ;;  %s231_s6 = sand.u32 1, %s889_s20  }
  0x1f   : > { %s103_s7 = ssub.s32 %s897_s22, %s1175_s25  ;;  %s624_s9 = smul.u32 3, %s231_s6 }
  0x20   : > { %p106_p10 = scmp.eq.s32.totalorder %s103_s7, 0  ;;  %s625_s10 = smul.u32 3, %s897_s22 }
  0x21   : > { %p656_p11 = pnand %p666_p5, %p117_p7  ;;  %s235_s15 = scalar_lea.vmem [#allocation10], %s624_s9 }
  0x22   : > { %s1031_s11 = scalar_select %p106_p10, %s889_s20, %s108_s24  }
  0x23   : > { %s240_s27 = scalar_lea.hbm %s1156_s3, %s625_s10  ;;  %s243_s16 = sshll.u32 %s235_s15, 4  ;;  %s244_s16 = int_to_ptr.vmem [resolvable:$true] %s243_s16 }
  0x24   : > { %s241_s14 = sshll.u32 %s240_s27, 4  ;;  %s232_s17 = scalar_lea.sflag [#allocation3], %s231_s6  ;;  %s242_s14 = int_to_ptr.hbm [resolvable:$true] %s241_s14 }
  0x25   : > { %s906_s0 = smov 16   ;;  %s907_s1 = smov 1  }
  0x26   : > { %658 = dma.hbm_to_vmem [thread:$0]  (!%p656_p11), %s242_s14, 48, %s244_s16, %s232_s17, %s906_s0, %s906_s0, %s907_s1  }
  0x27   : > { %264 = sbr.rel (%p997_p8) target bundleno = 108 (0x6c), region = 40 }
  0x2c   : > { %860 = dma.done.wait (%p974_p1), [#allocation5], 16  }
  0x2d   : > { %862 = vsyncadd (%p974_p1), [#allocation5], 4294967280 }
  0x2e   : > { %864 = dma.done.wait (%p974_p1), [#allocation8], 16  }
  0x2f   : > { %866 = vsyncadd (%p974_p1), [#allocation8], 4294967280 }
  0x30   : > { %868 = dma.done.wait (%p974_p1), [#allocation6], 16  }
  0x31   : > { %870 = vsyncadd (%p974_p1), [#allocation6], 4294967280  ;;  %s1051_s0 = sand.u32 1, %s885_s19  }
  0x32   : > { %s626_s1 = smul.u32 3, %s1051_s0  ;;  %s282_s8 = scalar_lea.sflag [#allocation3], %s1051_s0 }
  0x34   : > { %s285_s24 = scalar_lea.vmem [#allocation10], %s626_s1 }
  0x35   : > { %872 = dma.done.wait (%p984_p4), %s282_s8, 48  }
  0x36   : > { %874 = vsyncadd (%p984_p4), %s282_s8, 4294967248 }
  0x37   : > { %291 = sfence }
  0x38   : > { %p320_p2 = scmp.lt.s32.totalorder %s893_s21, 1  ;;  %s337_s26 = sld [smem:[#allocation2]]  ;;  %v329_v0 = vld [vmem:[%s285_s24] sm:$0x1]  ;;  %v596_v1 = vld [vmem:[%s285_s24 + $0x1] sm:$0x1] }
  0x39   : > { %s340_s6 = sld [smem:[#allocation7]]  ;;  %v1064_v2 = vunpack.c.l.bf16 %v329_v0  ;;  %v597_v4 = vld [vmem:[%s285_s24 + $0x2] sm:$0x1]  ;;  %v1066_v6 = vunpack.c.l.bf16 %v596_v1 }
  0x3a   : > { %s321_s7 = scalar_select %p320_p2, %s893_s21, 1  ;;  %v1075_v10 = vunpack.c.l.bf16 %v597_v4 }
  0x3b   : > { %s598_s9 = sld [smem:[#allocation2 + $0x1]] }
  0x3c   : > { %s325_s13 = scalar_lea.vmem %s1157_s4, %s321_s7  ;;  %s599_s27 = sld [smem:[#allocation7 + $0x1]] }
  0x3d   : > { %s600_s14 = sld [smem:[#allocation2 + $0x2]]  ;;  %v326_v3 = vld [vmem:[%s325_s13] sm:$0x1] }
  0x3e   : > { %v338_v5 = vstv %s337_s26  ;;  %s601_s28 = sld [smem:[#allocation7 + $0x2]]  ;;  %v1073_v9 = vunpack.c.l.bf16 %v326_v3 }
  0x3f   : > { %v341_v7 = vstv %s340_s6  ;;  %s1068_s15 = sld [smem:[#allocation9]]  ;;  %v339_v8 = vmul.f32 %v338_v5, %v1064_v2 }
  0x40   : > { %s1071_s16 = sld [smem:[#allocation9 + $0x3]]  ;;  %v342_v11 = vmul.f32 %v341_v7, %v1064_v2  ;;  %v1082_v20 = vsub.f32 1.0, %v1073_v9 }
  0x41   : > { %v344_v12 = vstv %s598_s9  ;;  %s603_s17 = sld [smem:[#allocation2 + $0x3]] }
  0x42   : > { %v345_v13 = vmul.f32 %v344_v12, %v1066_v6  ;;  %v348_v14 = vstv %s599_s27  ;;  %s604_s1 = sld [smem:[#allocation7 + $0x3]] }
  0x43   : > { %v349_v15 = vmul.f32 %v348_v14, %v1066_v6  ;;  %v352_v16 = vstv %s600_s14  ;;  %s605_s8 = sld [smem:[#allocation2 + $0x4]] }
  0x44   : > { %v346_v17 = vadd.f32 %v345_v13, %v339_v8  ;;  %v353_v18 = vmul.f32 %v352_v16, %v1075_v10  ;;  %v356_v19 = vstv %s601_s28  ;;  %s606_s24 = sld [smem:[#allocation7 + $0x4]] }
  0x45   : > { %v350_v21 = vadd.f32 %v349_v15, %v342_v11  ;;  %v357_v22 = vmul.f32 %v356_v19, %v1075_v10  ;;  %s607_s26 = sld [smem:[#allocation2 + $0x5]]  ;;  %v362_v23 = vstv %s1068_s15 }
  0x46   : > { %s608_s6 = sld [smem:[#allocation7 + $0x5]]  ;;  %v354_v24 = vadd.f32 %v353_v18, %v346_v17  ;;  %v363_v30 = vmul.f32 %v362_v23, %v1073_v9  ;;  %v366_v38 = vstv %s1071_s16  ;;  %s627_s16 = smul.u32 6, %s1051_s0 }
  0x47   : > { %v358_v25 = vadd.f32 %v357_v22, %v350_v21  ;;  %v371_v26 = vstv %s603_s17  ;;  %s1086_s7 = sld [smem:[#allocation9 + $0x1]] }
  0x48   : > { %v372_v27 = vmul.f32 %v371_v26, %v1064_v2  ;;  %v374_v28 = vstv %s604_s1  ;;  %s1089_s9 = sld [smem:[#allocation9 + $0x4]]  ;;  %s319_s1 = scalar_lea.vmem [#allocation11], %s627_s16 }
  0x49   : > { %v359_v29 = vmul.f32 %v358_v25, %v1082_v20  ;;  %v375_v31 = vmul.f32 %v374_v28, %v1064_v2  ;;  %v377_v32 = vstv %s605_s8  ;;  %s612_s10 = sld [smem:[#allocation2 + $0x6]]  ;;  %s628_s8 = smul.u32 6, %s893_s21 }
  0x4a   : > { %v378_v33 = vmul.f32 %v377_v32, %v1066_v6  ;;  %v381_v34 = vstv %s606_s24  ;;  %s613_s12 = sld [smem:[#allocation7 + $0x6]] }
  0x4b   : > { %v360_v35 = vadd.f32 %v359_v29, %v354_v24  ;;  %v382_v36 = vmul.f32 %v381_v34, %v1066_v6  ;;  %v385_v37 = vstv %s607_s26  ;;  %s614_s13 = sld [smem:[#allocation2 + $0x7]] }
  0x4c   : > { %v379_v39 = vadd.f32 %v378_v33, %v372_v27  ;;  %v386_v40 = vmul.f32 %v385_v37, %v1075_v10  ;;  %v389_v41 = vstv %s608_s6  ;;  %s615_s27 = sld [smem:[#allocation7 + $0x7]]  ;;  %s451_s6 = scalar_lea.hbm %s1158_s5, %s628_s8 }
  0x4d   : > { %v364_v42 = vadd.f32 %v363_v30, %v360_v35  ;;  %v383_v43 = vadd.f32 %v382_v36, %v375_v31  ;;  %v390_v44 = vmul.f32 %v389_v41, %v1075_v10  ;;  %v395_v45 = vstv %s1086_s7  ;;  %s616_s14 = sld [smem:[#allocation2 + $0x8]]  ;;  %s452_s7 = sshll.u32 %s319_s1, 4  ;;  %s453_s7 = int_to_ptr.vmem [resolvable:$true] %s452_s7 }
  0x4e   : > { %s617_s28 = sld [smem:[#allocation7 + $0x8]]  ;;  %v387_v47 = vadd.f32 %v386_v40, %v379_v39  ;;  %v396_v50 = vmul.f32 %v395_v45, %v1073_v9  ;;  %v399_v61 = vstv %s1089_s9  ;;  %s454_s9 = sshll.u32 %s451_s6, 4  ;;  %s455_s9 = int_to_ptr.hbm [resolvable:$true] %s454_s9 }
  0x4f   : > { %v367_v46 = vadd.f32 %v366_v38, %v364_v42  ;;  %v391_v48 = vadd.f32 %v390_v44, %v383_v43  ;;  %v405_v49 = vstv %s612_s10  ;;  %s1100_s15 = sld [smem:[#allocation9 + $0x2]]  ;;  %s439_s10 = scalar_lea.sflag [#allocation4], %s1051_s0 }
  0x50   : > { %v406_v51 = vmul.f32 %v405_v49, %v1064_v2  ;;  %v408_v52 = vstv %s613_s12  ;;  %s619_s17 = sld [smem:[#allocation9 + $0x5]]  ;;  %s821_s12 = sshra.s32 %s455_s9, 4  ;;  %s822_s12 = int_to_ptr.hbm [resolvable:$true] %s821_s12 }
  0x51   : > { %726 = vtanh.f32 %v367_v46  ;;  %v392_v53 = vmul.f32 %v391_v48, %v1082_v20  ;;  %v409_v54 = vmul.f32 %v408_v52, %v1064_v2  ;;  %v411_v55 = vstv %s614_s13  ;;  %s823_s21 = scalar_lea.hbm %s822_s12, 6  ;;  %p828_p12 = scmp.lt.s32.totalorder %s822_s12, %s1158_s5 }
  0x52   : > { %v412_v56 = vmul.f32 %v411_v55, %v1066_v6  ;;  %v415_v57 = vstv %s615_s27  ;;  %p824_p1 = scmp.ne.s32.totalorder %s822_s12, %s823_s21 }
  0x53   : > { %v393_v58 = vadd.f32 %v392_v53, %v387_v47  ;;  %v416_v59 = vmul.f32 %v415_v57, %v1066_v6  ;;  %v419_v60 = vstv %s616_s14  ;;  %s827_s14 = scalar_lea.hbm %s1158_s5, 12 }
  0x54   : > { %v413_v62 = vadd.f32 %v412_v56, %v406_v51  ;;  %v420_v63 = vmul.f32 %v419_v60, %v1075_v10  ;;  %v423_v0 = vstv %s617_s28  ;;  %p825_p4 = pnand %p824_p1, %p1019_p3  ;;  %p829_p13 = scmp.lt.s32.totalorder %s827_s14, %s823_s21 }
  0x55   : > { %v397_v1 = vadd.f32 %v396_v50, %v393_v58  ;;  %v417_v3 = vadd.f32 %v416_v59, %v409_v54  ;;  %v424_v4 = vmul.f32 %v423_v0, %v1075_v10  ;;  %v429_v2 = vstv %s1100_s15 }
  0x56   : > { %v421_v8 = vadd.f32 %v420_v63, %v413_v62  ;;  %v430_v12 = vmul.f32 %v429_v2, %v1073_v9  ;;  %v433_v14 = vstv %s619_s17  ;;  %p826_p8 = pneg %p825_p4  ;;  %p830_p0 = por %p829_p13, %p828_p12 }
  0x57   : > { %v727_v5 = vpop.eup %726  ;;  %v400_v7 = vadd.f32 %v399_v61, %v397_v1  ;;  %v425_v11 = vadd.f32 %v424_v4, %v417_v3 }
  0x58   : > { %369 = vst [vmem:[%s319_s1] sm:$0x3] %v727_v5  ;;  %p831_p5 = pnand %p830_p0, %p826_p8 }
  0x59   : > { %728 = vtanh.f32 %v400_v7  ;;  %v426_v6 = vmul.f32 %v425_v11, %v1082_v20 }
  0x5b   : > { %v427_v13 = vadd.f32 %v426_v6, %v421_v8 }
  0x5d   : > { %v431_v15 = vadd.f32 %v430_v12, %v427_v13 }
  0x5f   : > { %v729_v16 = vpop.eup %728  ;;  %v434_v10 = vadd.f32 %v433_v14, %v431_v15 }
  0x60   : > { %611 = vst [vmem:[%s319_s1 + $0x2] sm:$0x3] %v729_v16 }
  0x61   : > { %730 = vtanh.f32 %v434_v10 }
  0x67   : > { %v731_v17 = vpop.eup %730 }
  0x68   : > { %620 = vst [vmem:[%s319_s1 + $0x4] sm:$0x3] %v731_v17 }
  0x69   : > { %834 = shalt.err (!%p831_p5)
}
  0x6a   : > { %s908_s0 = smov 32   ;;  %s909_s16 = smov 2  }
  0x6b   : > { %643 = dma.vmem_to_hbm [thread:$0]  (%p1019_p3), %s453_s7, 96, %s455_s9, %s439_s10, %s908_s0, %s908_s0, %s909_s16  }
  0x6c PF: > { %s469_s17 = sand.u32 1, %s881_s18   ;;  %p660_p7 = pnand %p591_p9, %p989_p6 }
  0x6d   : > { %s470_s1 = scalar_lea.sflag [#allocation4], %s469_s17 }
  0x6e   : > { %p661_p10 = pneg %p660_p7 }
  0x70   : > { %876 = dma.done.wait (%p661_p10), %s470_s1, 96  }
  0x71   : > { %878 = vsyncadd (%p661_p10), %s470_s1, 4294967200  ;;  %s24_s23 = sadd.s32 1, %s901_s23   ;;  %s1169_s18 = smov %s885_s19 }
  0x72   : > { %p21_p11 = scmp.ge.s32.totalorder %s24_s23, 4   ;;  %s1170_s19 = smov %s889_s20 }
  0x73   : > { %s1171_s20 = smov %s1031_s11  ;;  %s1172_s21 = smov %s897_s22 }
  0x74   : > { %s1173_s22 = smov %s1175_s25  ;;  %23 = sbr.rel (!%p21_p11) target bundleno = 12 (0xc), region = 106 }
  0x79   :  { %476 = vsyncpa [#allocation3], 1 }
  0x7a   :  { %478 = vsyncpa [#allocation3 + $0x1], 1 }
  0x7b   :  { %479 = vsyncpa [#allocation4], 1 }
  0x7c   :  { %481 = vsyncpa [#allocation4 + $0x1], 1 }
  0x7d   :  { %482 = vsyncpa [#allocation5], 1 }
  0x7e   :  { %484 = vsyncpa [#allocation5 + $0x1], 1 }
  0x7f   :  { %485 = vsyncpa [#allocation8], 1 }
  0x80   :  { %486 = vsyncpa [#allocation6], 1 }
  0x81   :  { %488 = vsyncpa [#allocation6 + $0x1], 1 }

</bundles_post_ra>
